<compile_context>
chip_gen: v7x
topology: tpu7x:2x2x1
jax: 0.10.0
libtpu: 0.0.40
codegen_flags: <defaults>
</compile_context>

<pallas_src>
import functools
import math

import jax
import jax.numpy as jnp
from jax.experimental import pallas as pl
from jax.experimental.pallas import tpu as pltpu


# ---------------------------------------------------------------------------
# Activations (shared by the kernel and the pure-JAX reference).
# ---------------------------------------------------------------------------
def _softplus(x):
    # numerically-safe softplus: max(x,0) + log1p(exp(-|x|))
    return jnp.maximum(x, 0.0) + jnp.log1p(jnp.exp(-jnp.abs(x)))


def _apply_activation(x, activation):
    if activation == "relu":
        return jnp.maximum(x, 0.0)
    if activation == "sigmoid":
        return jax.nn.sigmoid(x)
    if activation == "meanact":           # MeanAct
        return jnp.clip(jnp.exp(x), 1e-5, 1e6)
    if activation == "dispact":           # DispAct
        return jnp.clip(_softplus(x), 1e-4, 1e4)
    return x                              # "none"


def _round_up(x, m):
    return ((x + m - 1) // m) * m


# ---------------------------------------------------------------------------
# Fully fused AutoEncoder kernel.
#
# refs layout:
#   refs[0]                      : x tile            (bm, Dp)   bf16
#   refs[1 : 1+2*n_lin]          : [wt_i, b_i] pairs (Kp_i,Np_i) bf16 / (1,Np_i) f32
#   refs[1+2*n_lin : ]           : z, mean, disp, pi output tiles (f32)
# Layer order: encoder..., enc_mu, decoder..., dec_mean, dec_disp, dec_pi.
# ---------------------------------------------------------------------------
def _fused_ae_kernel(*refs, n_enc, n_dec, activation):
    n_lin = n_enc + 1 + n_dec + 3
    x_ref = refs[0]
    wb = refs[1:1 + 2 * n_lin]
    z_ref, mean_ref, disp_ref, pi_ref = refs[1 + 2 * n_lin:]

    def lin(h, idx):
        # bf16 MXU inputs, f32 accumulation, f32 bias add (epilogue in f32).
        w = wb[2 * idx][...]
        b = wb[2 * idx + 1][...]
        return jnp.dot(h, w, preferred_element_type=jnp.float32) + b

    li = 0
    h = x_ref[...]                                           # bf16 (bm, Dp)
    # Encoder: [Linear -> (GaussianNoise: identity at eval) -> act] * n_enc
    for _ in range(n_enc):
        h = _apply_activation(lin(h, li), activation).astype(jnp.bfloat16)
        li += 1
    # Bottleneck z (no activation).
    z = lin(h, li)
    li += 1
    z_ref[...] = z.astype(z_ref.dtype)
    # Decoder: [Linear -> act] * n_dec
    h = z.astype(jnp.bfloat16)
    for _ in range(n_dec):
        h = _apply_activation(lin(h, li), activation).astype(jnp.bfloat16)
        li += 1
    # Three heads share the same decoder output h (read once, in vregs).
    mean_ref[...] = _apply_activation(lin(h, li + 0), "meanact").astype(mean_ref.dtype)
    disp_ref[...] = _apply_activation(lin(h, li + 1), "dispact").astype(disp_ref.dtype)
    pi_ref[...] = _apply_activation(lin(h, li + 2), "sigmoid").astype(pi_ref.dtype)


# ---------------------------------------------------------------------------
# One-time weight pre-packing: W (N, K) f32 -> W^T (Kp, Np) bf16, bias -> (1, Np) f32,
# both zero-padded to 128-lane multiples so padded columns/rows are inert.
# ---------------------------------------------------------------------------
def prepack_params(params):
    order = (list(params["encoder"]) + [params["enc_mu"]] + list(params["decoder"])
             + [params["dec_mean"], params["dec_disp"], params["dec_pi"]])
    packed = []
    for w, b in order:
        n_out, k_in = w.shape
        kp, np_ = _round_up(k_in, 128), _round_up(n_out, 128)
        wt = jnp.zeros((kp, np_), jnp.bfloat16).at[:k_in, :n_out].set(
            w.T.astype(jnp.bfloat16))
        bp = jnp.zeros((1, np_), jnp.float32).at[:, :n_out].set(b.astype(jnp.float32))
        packed.extend([wt, bp])
    return packed


def _pick_bm(bp_rows, bytes_per_row, budget=12 << 20):
    """Row tile: multiple of 16 (bf16 sublane packing); prefer >=2 tiles so v7x's
    second TensorCore gets work; keep the streamed per-tile bytes within budget."""
    cands = [bm for bm in (256, 128, 64, 32, 16) if bp_rows % bm == 0]
    if not cands:
        return min(bp_rows, 256)
    for bm in cands:
        if bp_rows // bm >= 2 and 2 * bm * bytes_per_row <= budget:
            return bm
    for bm in cands:
        if 2 * bm * bytes_per_row <= budget:
            return bm
    return cands[-1]


# ---------------------------------------------------------------------------
# Fused forward (single pallas_call).
# ---------------------------------------------------------------------------
@functools.partial(jax.jit,
                   static_argnames=("n_enc", "n_dec", "z_dim", "input_dim", "activation"))
def autoencoder_forward(packed, x, *, n_enc, n_dec, z_dim, input_dim, activation="relu"):
    n_lin = n_enc + 1 + n_dec + 3
    assert len(packed) == 2 * n_lin

    B, D = x.shape
    Dp = packed[0].shape[0]                       # padded input width (K of first layer)
    Zp = packed[2 * n_enc].shape[1]               # padded z width
    Op = packed[2 * (n_enc + 1 + n_dec)].shape[1]  # padded head width (== padded input_dim)

    # Row tiling over the batch (the only grid axis, "parallel").
    bytes_per_row = Dp * 2 + Zp * 4 + 3 * Op * 4  # streamed input + output rows
    Bp = _round_up(B, 16)
    bm = _pick_bm(Bp, bytes_per_row)
    Bp = _round_up(Bp, bm)
    grid = (Bp // bm,)

    # Pad + cast the input once (weights were pre-packed outside the forward).
    xb = jnp.zeros((Bp, Dp), jnp.bfloat16).at[:B, :D].set(x.astype(jnp.bfloat16))

    # Specs: x row tile streams; every weight/bias is VMEM-resident (constant index).
    in_specs = [pl.BlockSpec((bm, Dp), lambda i: (i, 0))]
    for li in range(n_lin):
        in_specs.append(pl.BlockSpec(packed[2 * li].shape, lambda i: (0, 0)))
        in_specs.append(pl.BlockSpec(packed[2 * li + 1].shape, lambda i: (0, 0)))

    out_shape = (
        jax.ShapeDtypeStruct((Bp, Zp), jnp.float32),
        jax.ShapeDtypeStruct((Bp, Op), jnp.float32),
        jax.ShapeDtypeStruct((Bp, Op), jnp.float32),
        jax.ShapeDtypeStruct((Bp, Op), jnp.float32),
    )
    out_specs = [
        pl.BlockSpec((bm, Zp), lambda i: (i, 0)),
        pl.BlockSpec((bm, Op), lambda i: (i, 0)),
        pl.BlockSpec((bm, Op), lambda i: (i, 0)),
        pl.BlockSpec((bm, Op), lambda i: (i, 0)),
    ]

    # Cost estimate + an explicit, estimate-driven VMEM limit (safe on v7x's 64 MiB/TC).
    flops = sum(2 * Bp * packed[2 * li].shape[0] * packed[2 * li].shape[1]
                for li in range(n_lin))
    weights_bytes = sum(int(a.size) * a.dtype.itemsize for a in packed)
    est = 2 * (weights_bytes + bm * bytes_per_row) + (2 << 20)
    vmem_limit = int(min(max(est, 16 << 20), 48 << 20))
    cost = pl.CostEstimate(
        flops=int(flops),
        transcendentals=int(4 * Bp * Op),
        bytes_accessed=int(xb.size * 2 + weights_bytes + (Bp * Zp + 3 * Bp * Op) * 4),
    )

    z, mean, disp, pi = pl.pallas_call(
        functools.partial(_fused_ae_kernel, n_enc=n_enc, n_dec=n_dec,
                          activation=activation),
        out_shape=out_shape,
        grid_spec=pltpu.PrefetchScalarGridSpec(
            num_scalar_prefetch=0,
            grid=grid,
            in_specs=in_specs,
            out_specs=out_specs,
        ),
        compiler_params=pltpu.CompilerParams(
            dimension_semantics=("parallel",),
            vmem_limit_bytes=vmem_limit),
        cost_estimate=cost,
    )(xb, *packed)

    # Single slice at the very end for user-facing outputs.
    return (z[:B, :z_dim], mean[:B, :input_dim],
            disp[:B, :input_dim], pi[:B, :input_dim])


# ---------------------------------------------------------------------------
# Pure-JAX reference with identical dtype handling (bf16 MXU inputs, f32 acc).
# ---------------------------------------------------------------------------
def autoencoder_forward_ref(params, x, activation="relu"):
    def lin(h, w, b, act, dt):
        acc = jnp.dot(h.astype(jnp.bfloat16), w.T.astype(jnp.bfloat16),
                      preferred_element_type=jnp.float32)
        acc = acc + b.astype(jnp.float32)[None, :]
        return _apply_activation(acc, act).astype(dt)

    h = x
    for w, b in params["encoder"]:
        h = lin(h, w, b, activation, jnp.bfloat16)
    z = lin(h, *params["enc_mu"], "none", jnp.float32)
    h = z
    for w, b in params["decoder"]:
        h = lin(h, w, b, activation, jnp.bfloat16)
    mean = lin(h, *params["dec_mean"], "meanact", jnp.float32)
    disp = lin(h, *params["dec_disp"], "dispact", jnp.float32)
    pi = lin(h, *params["dec_pi"], "sigmoid", jnp.float32)
    return z, mean, disp, pi


# ---------------------------------------------------------------------------
# Parameter init (mimics nn.Linear default bounds).
# ---------------------------------------------------------------------------
def _init_linear(key, in_dim, out_dim):
    kw, kb = jax.random.split(key)
    bound = 1.0 / math.sqrt(in_dim)
    w = jax.random.uniform(kw, (out_dim, in_dim), minval=-bound, maxval=bound,
                           dtype=jnp.float32)
    b = jax.random.uniform(kb, (out_dim,), minval=-bound, maxval=bound,
                           dtype=jnp.float32)
    return w, b


def init_autoencoder(key, input_dim, z_dim, encode_layers, decode_layers):
    n_keys = len(encode_layers) + len(decode_layers) + 4
    keys = list(jax.random.split(key, n_keys))
    params = {"encoder": [], "decoder": []}
    dims = [input_dim] + list(encode_layers)
    for i in range(1, len(dims)):
        params["encoder"].append(_init_linear(keys.pop(0), dims[i - 1], dims[i]))
    params["enc_mu"] = _init_linear(keys.pop(0), encode_layers[-1], z_dim)
    dims = [z_dim] + list(decode_layers)
    for i in range(1, len(dims)):
        params["decoder"].append(_init_linear(keys.pop(0), dims[i - 1], dims[i]))
    params["dec_mean"] = _init_linear(keys.pop(0), decode_layers[-1], input_dim)
    params["dec_disp"] = _init_linear(keys.pop(0), decode_layers[-1], input_dim)
    params["dec_pi"] = _init_linear(keys.pop(0), decode_layers[-1], input_dim)
    return params


if __name__ == "__main__":
    key = jax.random.PRNGKey(0)
    k_params, k_x = jax.random.split(key)

    batch, input_dim, z_dim = 8, 32, 16
    encode_layers, decode_layers = [64, 32], [32, 64]

    params = init_autoencoder(k_params, input_dim, z_dim, encode_layers, decode_layers)
    x = jax.random.normal(k_x, (batch, input_dim), dtype=jnp.float32)

    # TODO(synk): GaussianNoise in the PyTorch encoder is training-only noise injection;
    # this forward is inference-mode, so it is the identity.
    packed = prepack_params(params)            # one-time weight pack (bf16, padded, W^T)

    z, mean, disp, pi = jax.block_until_ready(
        autoencoder_forward(packed, x,
                            n_enc=len(encode_layers), n_dec=len(decode_layers),
                            z_dim=z_dim, input_dim=input_dim, activation="relu"))

    # Reference check (same math / dtype path, plain XLA).
    z_r, mean_r, disp_r, pi_r = autoencoder_forward_ref(params, x)

    assert z.shape == (batch, z_dim)
    assert mean.shape == disp.shape == pi.shape == (batch, input_dim)
    for got, ref in ((z, z_r), (mean, mean_r), (disp, disp_r), (pi, pi_r)):
        assert jnp.allclose(got, ref, atol=2e-2, rtol=2e-2), \
            float(jnp.max(jnp.abs(got - ref)))

    print("KERNEL_OK")
</pallas_src>

<mosaic_0001>
module attributes {stable_mosaic.version = 11 : i64} {
  func.func @_fused_ae_kernel(%arg0: i32, %arg1: memref<16x128xbf16, #tpu.memory_space<vmem>>, %arg2: memref<128x128xbf16, #tpu.memory_space<vmem>>, %arg3: memref<1x128xf32, #tpu.memory_space<vmem>>, %arg4: memref<128x128xbf16, #tpu.memory_space<vmem>>, %arg5: memref<1x128xf32, #tpu.memory_space<vmem>>, %arg6: memref<128x128xbf16, #tpu.memory_space<vmem>>, %arg7: memref<1x128xf32, #tpu.memory_space<vmem>>, %arg8: memref<128x128xbf16, #tpu.memory_space<vmem>>, %arg9: memref<1x128xf32, #tpu.memory_space<vmem>>, %arg10: memref<128x128xbf16, #tpu.memory_space<vmem>>, %arg11: memref<1x128xf32, #tpu.memory_space<vmem>>, %arg12: memref<128x128xbf16, #tpu.memory_space<vmem>>, %arg13: memref<1x128xf32, #tpu.memory_space<vmem>>, %arg14: memref<128x128xbf16, #tpu.memory_space<vmem>>, %arg15: memref<1x128xf32, #tpu.memory_space<vmem>>, %arg16: memref<128x128xbf16, #tpu.memory_space<vmem>>, %arg17: memref<1x128xf32, #tpu.memory_space<vmem>>, %arg18: memref<16x128xf32, #tpu.memory_space<vmem>>, %arg19: memref<16x128xf32, #tpu.memory_space<vmem>>, %arg20: memref<16x128xf32, #tpu.memory_space<vmem>>, %arg21: memref<16x128xf32, #tpu.memory_space<vmem>>) attributes {dimension_semantics = [#tpu.dimension_semantics<parallel>], iteration_bounds = array<i64: 1>, scalar_prefetch = 0 : i64, scratch_operands = 0 : i64, tpu.core_type = #tpu.core_type<tc>, window_params = [{transform_indices = @transform_0, window_bounds = array<i64: 16, 128>}, {pipeline_mode = #tpu.pipeline_mode<synchronous>, transform_indices = @transform_1, window_bounds = array<i64: 128, 128>}, {pipeline_mode = #tpu.pipeline_mode<synchronous>, transform_indices = @transform_2, window_bounds = array<i64: 1, 128>}, {pipeline_mode = #tpu.pipeline_mode<synchronous>, transform_indices = @transform_3, window_bounds = array<i64: 128, 128>}, {pipeline_mode = #tpu.pipeline_mode<synchronous>, transform_indices = @transform_4, window_bounds = array<i64: 1, 128>}, {pipeline_mode = #tpu.pipeline_mode<synchronous>, transform_indices = @transform_5, window_bounds = array<i64: 128, 128>}, {pipeline_mode = #tpu.pipeline_mode<synchronous>, transform_indices = @transform_6, window_bounds = array<i64: 1, 128>}, {pipeline_mode = #tpu.pipeline_mode<synchronous>, transform_indices = @transform_7, window_bounds = array<i64: 128, 128>}, {pipeline_mode = #tpu.pipeline_mode<synchronous>, transform_indices = @transform_8, window_bounds = array<i64: 1, 128>}, {pipeline_mode = #tpu.pipeline_mode<synchronous>, transform_indices = @transform_9, window_bounds = array<i64: 128, 128>}, {pipeline_mode = #tpu.pipeline_mode<synchronous>, transform_indices = @transform_10, window_bounds = array<i64: 1, 128>}, {pipeline_mode = #tpu.pipeline_mode<synchronous>, transform_indices = @transform_11, window_bounds = array<i64: 128, 128>}, {pipeline_mode = #tpu.pipeline_mode<synchronous>, transform_indices = @transform_12, window_bounds = array<i64: 1, 128>}, {pipeline_mode = #tpu.pipeline_mode<synchronous>, transform_indices = @transform_13, window_bounds = array<i64: 128, 128>}, {pipeline_mode = #tpu.pipeline_mode<synchronous>, transform_indices = @transform_14, window_bounds = array<i64: 1, 128>}, {pipeline_mode = #tpu.pipeline_mode<synchronous>, transform_indices = @transform_15, window_bounds = array<i64: 128, 128>}, {pipeline_mode = #tpu.pipeline_mode<synchronous>, transform_indices = @transform_16, window_bounds = array<i64: 1, 128>}, {transform_indices = @transform_17, window_bounds = array<i64: 16, 128>}, {transform_indices = @transform_18, window_bounds = array<i64: 16, 128>}, {transform_indices = @transform_19, window_bounds = array<i64: 16, 128>}, {transform_indices = @transform_20, window_bounds = array<i64: 16, 128>}]} {
    %c0 = arith.constant 0 : index
    %c0_0 = arith.constant 0 : index
    %0 = vector.load %arg1[%c0, %c0_0] : memref<16x128xbf16, #tpu.memory_space<vmem>>, vector<16x128xbf16>
    %c0_1 = arith.constant 0 : index
    %c0_2 = arith.constant 0 : index
    %1 = vector.load %arg2[%c0_1, %c0_2] : memref<128x128xbf16, #tpu.memory_space<vmem>>, vector<128x128xbf16>
    %c0_3 = arith.constant 0 : index
    %c0_4 = arith.constant 0 : index
    %2 = vector.load %arg3[%c0_3, %c0_4] : memref<1x128xf32, #tpu.memory_space<vmem>>, vector<1x128xf32>
    %cst = arith.constant dense<0.000000e+00> : vector<16x128xf32>
    %3 = tpu.matmul %0, %1, %cst {dimension_numbers = #tpu.dot_dimension_numbers<[1], [0], [0], [1], [0, 0, 1, 1], [], []>} : vector<16x128xbf16>, vector<128x128xbf16>, vector<16x128xf32> -> vector<16x128xf32>
    %4 = vector.broadcast %2 : vector<1x128xf32> to vector<16x128xf32>
    %5 = arith.addf %3, %4 : vector<16x128xf32>
    %cst_5 = arith.constant 0.000000e+00 : f32
    %6 = vector.broadcast %cst_5 : f32 to vector<16x128xf32>
    %7 = arith.maximumf %5, %6 : vector<16x128xf32>
    %8 = arith.truncf %7 : vector<16x128xf32> to vector<16x128xbf16>
    %c0_6 = arith.constant 0 : index
    %c0_7 = arith.constant 0 : index
    %9 = vector.load %arg4[%c0_6, %c0_7] : memref<128x128xbf16, #tpu.memory_space<vmem>>, vector<128x128xbf16>
    %c0_8 = arith.constant 0 : index
    %c0_9 = arith.constant 0 : index
    %10 = vector.load %arg5[%c0_8, %c0_9] : memref<1x128xf32, #tpu.memory_space<vmem>>, vector<1x128xf32>
    %cst_10 = arith.constant dense<0.000000e+00> : vector<16x128xf32>
    %11 = tpu.matmul %8, %9, %cst_10 {dimension_numbers = #tpu.dot_dimension_numbers<[1], [0], [0], [1], [0, 0, 1, 1], [], []>} : vector<16x128xbf16>, vector<128x128xbf16>, vector<16x128xf32> -> vector<16x128xf32>
    %12 = vector.broadcast %10 : vector<1x128xf32> to vector<16x128xf32>
    %13 = arith.addf %11, %12 : vector<16x128xf32>
    %cst_11 = arith.constant 0.000000e+00 : f32
    %14 = vector.broadcast %cst_11 : f32 to vector<16x128xf32>
    %15 = arith.maximumf %13, %14 : vector<16x128xf32>
    %16 = arith.truncf %15 : vector<16x128xf32> to vector<16x128xbf16>
    %c0_12 = arith.constant 0 : index
    %c0_13 = arith.constant 0 : index
    %17 = vector.load %arg6[%c0_12, %c0_13] : memref<128x128xbf16, #tpu.memory_space<vmem>>, vector<128x128xbf16>
    %c0_14 = arith.constant 0 : index
    %c0_15 = arith.constant 0 : index
    %18 = vector.load %arg7[%c0_14, %c0_15] : memref<1x128xf32, #tpu.memory_space<vmem>>, vector<1x128xf32>
    %cst_16 = arith.constant dense<0.000000e+00> : vector<16x128xf32>
    %19 = tpu.matmul %16, %17, %cst_16 {dimension_numbers = #tpu.dot_dimension_numbers<[1], [0], [0], [1], [0, 0, 1, 1], [], []>} : vector<16x128xbf16>, vector<128x128xbf16>, vector<16x128xf32> -> vector<16x128xf32>
    %20 = vector.broadcast %18 : vector<1x128xf32> to vector<16x128xf32>
    %21 = arith.addf %19, %20 : vector<16x128xf32>
    %c0_17 = arith.constant 0 : index
    %c0_18 = arith.constant 0 : index
    %22 = vector.load %arg18[%c0_17, %c0_18] : memref<16x128xf32, #tpu.memory_space<vmem>>, vector<16x128xf32>
    tpu.vector_store %arg18[%c0_17, %c0_18], %21 {strides = array<i32>} : memref<16x128xf32, #tpu.memory_space<vmem>>, vector<16x128xf32>,
    %23 = arith.truncf %21 : vector<16x128xf32> to vector<16x128xbf16>
    %c0_19 = arith.constant 0 : index
    %c0_20 = arith.constant 0 : index
    %24 = vector.load %arg8[%c0_19, %c0_20] : memref<128x128xbf16, #tpu.memory_space<vmem>>, vector<128x128xbf16>
    %c0_21 = arith.constant 0 : index
    %c0_22 = arith.constant 0 : index
    %25 = vector.load %arg9[%c0_21, %c0_22] : memref<1x128xf32, #tpu.memory_space<vmem>>, vector<1x128xf32>
    %cst_23 = arith.constant dense<0.000000e+00> : vector<16x128xf32>
    %26 = tpu.matmul %23, %24, %cst_23 {dimension_numbers = #tpu.dot_dimension_numbers<[1], [0], [0], [1], [0, 0, 1, 1], [], []>} : vector<16x128xbf16>, vector<128x128xbf16>, vector<16x128xf32> -> vector<16x128xf32>
    %27 = vector.broadcast %25 : vector<1x128xf32> to vector<16x128xf32>
    %28 = arith.addf %26, %27 : vector<16x128xf32>
    %cst_24 = arith.constant 0.000000e+00 : f32
    %29 = vector.broadcast %cst_24 : f32 to vector<16x128xf32>
    %30 = arith.maximumf %28, %29 : vector<16x128xf32>
    %31 = arith.truncf %30 : vector<16x128xf32> to vector<16x128xbf16>
    %c0_25 = arith.constant 0 : index
    %c0_26 = arith.constant 0 : index
    %32 = vector.load %arg10[%c0_25, %c0_26] : memref<128x128xbf16, #tpu.memory_space<vmem>>, vector<128x128xbf16>
    %c0_27 = arith.constant 0 : index
    %c0_28 = arith.constant 0 : index
    %33 = vector.load %arg11[%c0_27, %c0_28] : memref<1x128xf32, #tpu.memory_space<vmem>>, vector<1x128xf32>
    %cst_29 = arith.constant dense<0.000000e+00> : vector<16x128xf32>
    %34 = tpu.matmul %31, %32, %cst_29 {dimension_numbers = #tpu.dot_dimension_numbers<[1], [0], [0], [1], [0, 0, 1, 1], [], []>} : vector<16x128xbf16>, vector<128x128xbf16>, vector<16x128xf32> -> vector<16x128xf32>
    %35 = vector.broadcast %33 : vector<1x128xf32> to vector<16x128xf32>
    %36 = arith.addf %34, %35 : vector<16x128xf32>
    %cst_30 = arith.constant 0.000000e+00 : f32
    %37 = vector.broadcast %cst_30 : f32 to vector<16x128xf32>
    %38 = arith.maximumf %36, %37 : vector<16x128xf32>
    %39 = arith.truncf %38 : vector<16x128xf32> to vector<16x128xbf16>
    %c0_31 = arith.constant 0 : index
    %c0_32 = arith.constant 0 : index
    %40 = vector.load %arg12[%c0_31, %c0_32] : memref<128x128xbf16, #tpu.memory_space<vmem>>, vector<128x128xbf16>
    %c0_33 = arith.constant 0 : index
    %c0_34 = arith.constant 0 : index
    %41 = vector.load %arg13[%c0_33, %c0_34] : memref<1x128xf32, #tpu.memory_space<vmem>>, vector<1x128xf32>
    %cst_35 = arith.constant dense<0.000000e+00> : vector<16x128xf32>
    %42 = tpu.matmul %39, %40, %cst_35 {dimension_numbers = #tpu.dot_dimension_numbers<[1], [0], [0], [1], [0, 0, 1, 1], [], []>} : vector<16x128xbf16>, vector<128x128xbf16>, vector<16x128xf32> -> vector<16x128xf32>
    %43 = vector.broadcast %41 : vector<1x128xf32> to vector<16x128xf32>
    %44 = arith.addf %42, %43 : vector<16x128xf32>
    %45 = math.exp %44 : vector<16x128xf32>
    %cst_36 = arith.constant 9.99999974E-6 : f32
    %cst_37 = arith.constant 1.000000e+06 : f32
    %46 = vector.broadcast %cst_36 : f32 to vector<16x128xf32>
    %47 = arith.maximumf %46, %45 : vector<16x128xf32>
    %48 = vector.broadcast %cst_37 : f32 to vector<16x128xf32>
    %49 = arith.minimumf %48, %47 : vector<16x128xf32>
    %c0_38 = arith.constant 0 : index
    %c0_39 = arith.constant 0 : index
    %50 = vector.load %arg19[%c0_38, %c0_39] : memref<16x128xf32, #tpu.memory_space<vmem>>, vector<16x128xf32>
    tpu.vector_store %arg19[%c0_38, %c0_39], %49 {strides = array<i32>} : memref<16x128xf32, #tpu.memory_space<vmem>>, vector<16x128xf32>,
    %c0_40 = arith.constant 0 : index
    %c0_41 = arith.constant 0 : index
    %51 = vector.load %arg14[%c0_40, %c0_41] : memref<128x128xbf16, #tpu.memory_space<vmem>>, vector<128x128xbf16>
    %c0_42 = arith.constant 0 : index
    %c0_43 = arith.constant 0 : index
    %52 = vector.load %arg15[%c0_42, %c0_43] : memref<1x128xf32, #tpu.memory_space<vmem>>, vector<1x128xf32>
    %cst_44 = arith.constant dense<0.000000e+00> : vector<16x128xf32>
    %53 = tpu.matmul %39, %51, %cst_44 {dimension_numbers = #tpu.dot_dimension_numbers<[1], [0], [0], [1], [0, 0, 1, 1], [], []>} : vector<16x128xbf16>, vector<128x128xbf16>, vector<16x128xf32> -> vector<16x128xf32>
    %54 = vector.broadcast %52 : vector<1x128xf32> to vector<16x128xf32>
    %55 = arith.addf %53, %54 : vector<16x128xf32>
    %cst_45 = arith.constant 0.000000e+00 : f32
    %56 = vector.broadcast %cst_45 : f32 to vector<16x128xf32>
    %57 = arith.maximumf %55, %56 : vector<16x128xf32>
    %58 = math.absf %55 : vector<16x128xf32>
    %cst_46 = arith.constant 0.000000e+00 : f32
    %59 = vector.broadcast %cst_46 : f32 to vector<16x128xf32>
    %60 = arith.subf %59, %58 : vector<16x128xf32>
    %61 = math.exp %60 : vector<16x128xf32>
    %62 = math.log1p %61 : vector<16x128xf32>
    %63 = arith.addf %57, %62 : vector<16x128xf32>
    %cst_47 = arith.constant 9.99999974E-5 : f32
    %cst_48 = arith.constant 1.000000e+04 : f32
    %64 = vector.broadcast %cst_47 : f32 to vector<16x128xf32>
    %65 = arith.maximumf %64, %63 : vector<16x128xf32>
    %66 = vector.broadcast %cst_48 : f32 to vector<16x128xf32>
    %67 = arith.minimumf %66, %65 : vector<16x128xf32>
    %c0_49 = arith.constant 0 : index
    %c0_50 = arith.constant 0 : index
    %68 = vector.load %arg20[%c0_49, %c0_50] : memref<16x128xf32, #tpu.memory_space<vmem>>, vector<16x128xf32>
    tpu.vector_store %arg20[%c0_49, %c0_50], %67 {strides = array<i32>} : memref<16x128xf32, #tpu.memory_space<vmem>>, vector<16x128xf32>,
    %c0_51 = arith.constant 0 : index
    %c0_52 = arith.constant 0 : index
    %69 = vector.load %arg16[%c0_51, %c0_52] : memref<128x128xbf16, #tpu.memory_space<vmem>>, vector<128x128xbf16>
    %c0_53 = arith.constant 0 : index
    %c0_54 = arith.constant 0 : index
    %70 = vector.load %arg17[%c0_53, %c0_54] : memref<1x128xf32, #tpu.memory_space<vmem>>, vector<1x128xf32>
    %cst_55 = arith.constant dense<0.000000e+00> : vector<16x128xf32>
    %71 = tpu.matmul %39, %69, %cst_55 {dimension_numbers = #tpu.dot_dimension_numbers<[1], [0], [0], [1], [0, 0, 1, 1], [], []>} : vector<16x128xbf16>, vector<128x128xbf16>, vector<16x128xf32> -> vector<16x128xf32>
    %72 = vector.broadcast %70 : vector<1x128xf32> to vector<16x128xf32>
    %73 = arith.addf %71, %72 : vector<16x128xf32>
    %74 = arith.negf %73 : vector<16x128xf32>
    %75 = math.exp %74 : vector<16x128xf32>
    %cst_56 = arith.constant 1.000000e+00 : f32
    %76 = vector.broadcast %cst_56 : f32 to vector<16x128xf32>
    %77 = arith.addf %76, %75 : vector<16x128xf32>
    %78 = arith.divf %76, %77 : vector<16x128xf32>
    %c0_57 = arith.constant 0 : index
    %c0_58 = arith.constant 0 : index
    %79 = vector.load %arg21[%c0_57, %c0_58] : memref<16x128xf32, #tpu.memory_space<vmem>>, vector<16x128xf32>
    tpu.vector_store %arg21[%c0_57, %c0_58], %78 {strides = array<i32>} : memref<16x128xf32, #tpu.memory_space<vmem>>, vector<16x128xf32>,
    return
  }
  func.func @transform_0(%arg0: i32) -> (i32, i32) {
    %c0_i32 = arith.constant 0 : i32
    %c0_i32_0 = arith.constant 0 : i32
    return %arg0, %c0_i32 : i32, i32
  }
  func.func @transform_1(%arg0: i32) -> (i32, i32) {
    %c0_i32 = arith.constant 0 : i32
    %c0_i32_0 = arith.constant 0 : i32
    %c0_i32_1 = arith.constant 0 : i32
    return %c0_i32, %c0_i32_0 : i32, i32
  }
  func.func @transform_2(%arg0: i32) -> (i32, i32) {
    %c0_i32 = arith.constant 0 : i32
    %c0_i32_0 = arith.constant 0 : i32
    %c0_i32_1 = arith.constant 0 : i32
    return %c0_i32, %c0_i32_0 : i32, i32
  }
  func.func @transform_3(%arg0: i32) -> (i32, i32) {
    %c0_i32 = arith.constant 0 : i32
    %c0_i32_0 = arith.constant 0 : i32
    %c0_i32_1 = arith.constant 0 : i32
    return %c0_i32, %c0_i32_0 : i32, i32
  }
  func.func @transform_4(%arg0: i32) -> (i32, i32) {
    %c0_i32 = arith.constant 0 : i32
    %c0_i32_0 = arith.constant 0 : i32
    %c0_i32_1 = arith.constant 0 : i32
    return %c0_i32, %c0_i32_0 : i32, i32
  }
  func.func @transform_5(%arg0: i32) -> (i32, i32) {
    %c0_i32 = arith.constant 0 : i32
    %c0_i32_0 = arith.constant 0 : i32
    %c0_i32_1 = arith.constant 0 : i32
    return %c0_i32, %c0_i32_0 : i32, i32
  }
  func.func @transform_6(%arg0: i32) -> (i32, i32) {
    %c0_i32 = arith.constant 0 : i32
    %c0_i32_0 = arith.constant 0 : i32
    %c0_i32_1 = arith.constant 0 : i32
    return %c0_i32, %c0_i32_0 : i32, i32
  }
  func.func @transform_7(%arg0: i32) -> (i32, i32) {
    %c0_i32 = arith.constant 0 : i32
    %c0_i32_0 = arith.constant 0 : i32
    %c0_i32_1 = arith.constant 0 : i32
    return %c0_i32, %c0_i32_0 : i32, i32
  }
  func.func @transform_8(%arg0: i32) -> (i32, i32) {
    %c0_i32 = arith.constant 0 : i32
    %c0_i32_0 = arith.constant 0 : i32
    %c0_i32_1 = arith.constant 0 : i32
    return %c0_i32, %c0_i32_0 : i32, i32
  }
  func.func @transform_9(%arg0: i32) -> (i32, i32) {
    %c0_i32 = arith.constant 0 : i32
    %c0_i32_0 = arith.constant 0 : i32
    %c0_i32_1 = arith.constant 0 : i32
    return %c0_i32, %c0_i32_0 : i32, i32
  }
  func.func @transform_10(%arg0: i32) -> (i32, i32) {
    %c0_i32 = arith.constant 0 : i32
    %c0_i32_0 = arith.constant 0 : i32
    %c0_i32_1 = arith.constant 0 : i32
    return %c0_i32, %c0_i32_0 : i32, i32
  }
  func.func @transform_11(%arg0: i32) -> (i32, i32) {
    %c0_i32 = arith.constant 0 : i32
    %c0_i32_0 = arith.constant 0 : i32
    %c0_i32_1 = arith.constant 0 : i32
    return %c0_i32, %c0_i32_0 : i32, i32
  }
  func.func @transform_12(%arg0: i32) -> (i32, i32) {
    %c0_i32 = arith.constant 0 : i32
    %c0_i32_0 = arith.constant 0 : i32
    %c0_i32_1 = arith.constant 0 : i32
    return %c0_i32, %c0_i32_0 : i32, i32
  }
  func.func @transform_13(%arg0: i32) -> (i32, i32) {
    %c0_i32 = arith.constant 0 : i32
    %c0_i32_0 = arith.constant 0 : i32
    %c0_i32_1 = arith.constant 0 : i32
    return %c0_i32, %c0_i32_0 : i32, i32
  }
  func.func @transform_14(%arg0: i32) -> (i32, i32) {
    %c0_i32 = arith.constant 0 : i32
    %c0_i32_0 = arith.constant 0 : i32
    %c0_i32_1 = arith.constant 0 : i32
    return %c0_i32, %c0_i32_0 : i32, i32
  }
  func.func @transform_15(%arg0: i32) -> (i32, i32) {
    %c0_i32 = arith.constant 0 : i32
    %c0_i32_0 = arith.constant 0 : i32
    %c0_i32_1 = arith.constant 0 : i32
    return %c0_i32, %c0_i32_0 : i32, i32
  }
  func.func @transform_16(%arg0: i32) -> (i32, i32) {
    %c0_i32 = arith.constant 0 : i32
    %c0_i32_0 = arith.constant 0 : i32
    %c0_i32_1 = arith.constant 0 : i32
    return %c0_i32, %c0_i32_0 : i32, i32
  }
  func.func @transform_17(%arg0: i32) -> (i32, i32) {
    %c0_i32 = arith.constant 0 : i32
    %c0_i32_0 = arith.constant 0 : i32
    return %arg0, %c0_i32 : i32, i32
  }
  func.func @transform_18(%arg0: i32) -> (i32, i32) {
    %c0_i32 = arith.constant 0 : i32
    %c0_i32_0 = arith.constant 0 : i32
    return %arg0, %c0_i32 : i32, i32
  }
  func.func @transform_19(%arg0: i32) -> (i32, i32) {
    %c0_i32 = arith.constant 0 : i32
    %c0_i32_0 = arith.constant 0 : i32
    return %arg0, %c0_i32 : i32, i32
  }
  func.func @transform_20(%arg0: i32) -> (i32, i32) {
    %c0_i32 = arith.constant 0 : i32
    %c0_i32_0 = arith.constant 0 : i32
    return %arg0, %c0_i32 : i32, i32
  }
}

</mosaic_0001>

<bundles_post_ra>
// kernel: autoencoder_forward.1
= control target key start
LH: loop header
LB: loop body
LE: loop exit
PB: predicated region body
PF: predicated region fallthrough
CT: control target
= control target key end

     0   :  { %s2364_s0 = inlined_call_operand.vmem [shape: bf16[16,128], index: 0, kind: input, shape index: {}]   ;;  %s2365_s1 = inlined_call_operand.hbm [shape: bf16[128,128], index: 1, kind: input, shape index: {}]   ;;  %s2366_s2 = inlined_call_operand.vmem [shape: f32[1,128], index: 2, kind: input, shape index: {}]   ;;  %s2367_s3 = inlined_call_operand.hbm [shape: bf16[128,128], index: 3, kind: input, shape index: {}]   ;;  %s2368_s4 = inlined_call_operand.vmem [shape: f32[1,128], index: 4, kind: input, shape index: {}]   ;;  %s2369_s5 = inlined_call_operand.hbm [shape: bf16[128,128], index: 5, kind: input, shape index: {}]   ;;  %s2370_s6 = inlined_call_operand.hbm [shape: f32[1,128], index: 6, kind: input, shape index: {}]   ;;  %s2371_s7 = inlined_call_operand.hbm [shape: bf16[128,128], index: 7, kind: input, shape index: {}]   ;;  %s2372_s8 = inlined_call_operand.hbm [shape: f32[1,128], index: 8, kind: input, shape index: {}]   ;;  %s2373_s9 = inlined_call_operand.hbm [shape: bf16[128,128], index: 9, kind: input, shape index: {}]   ;;  %s2374_s10 = inlined_call_operand.hbm [shape: f32[1,128], index: 10, kind: input, shape index: {}]   ;;  %s2375_s11 = inlined_call_operand.hbm [shape: bf16[128,128], index: 11, kind: input, shape index: {}]   ;;  %s2376_s12 = inlined_call_operand.hbm [shape: f32[1,128], index: 12, kind: input, shape index: {}]   ;;  %s2377_s13 = inlined_call_operand.vmem [shape: bf16[128,128], index: 13, kind: input, shape index: {}]   ;;  %s2378_s14 = inlined_call_operand.hbm [shape: f32[1,128], index: 14, kind: input, shape index: {}]   ;;  %s2379_s15 = inlined_call_operand.hbm [shape: bf16[128,128], index: 15, kind: input, shape index: {}]   ;;  %s2380_s16 = inlined_call_operand.vmem [shape: f32[1,128], index: 16, kind: input, shape index: {}]   ;;  %s2381_s17 = inlined_call_operand.vmem [shape: f32[16,128], index: 17, kind: output, shape index: {0}]   ;;  %s2382_s18 = inlined_call_operand.vmem [shape: f32[16,128], index: 18, kind: output, shape index: {1}]   ;;  %s2383_s19 = inlined_call_operand.vmem [shape: f32[16,128], index: 19, kind: output, shape index: {2}]   ;;  %s2384_s20 = inlined_call_operand.vmem [shape: f32[16,128], index: 20, kind: output, shape index: {3}]  }
   0x1   :  { %2389 = sst [smem:[#allocation28_spill]] %s2364_s0 }
   0x2   :  { %2390 = sst [smem:[#allocation29_spill]] %s2365_s1 }
   0x3   :  { %2391 = sst [smem:[#allocation30_spill]] %s2366_s2 }
   0x4   :  { %2392 = sst [smem:[#allocation31_spill]] %s2367_s3 }
   0x5   :  { %2393 = sst [smem:[#allocation32_spill]] %s2368_s4 }
   0x6   :  { %26 = vsyncpa [#allocation3], 0 }
   0x7   :  { %27 = vsyncpa [#allocation5], 0 }
   0x8   :  { %28 = vsyncpa [#allocation8], 0 }
   0x9   :  { %29 = vsyncpa [#allocation11], 0 }
   0xa   :  { %30 = vsyncpa [#allocation14], 0 }
   0xb   :  { %31 = vsyncpa [#allocation17], 0 }
   0xc   :  { %32 = vsyncpa [#allocation20], 0  ;;  %s1902_s1 = smov [#allocation4]   ;;  %s1903_s23 = smov [#allocation7]  }
   0xd   :  { %s54_s22 = sshll.u32 %s1902_s1, 4  ;;  %s81_s24 = sshll.u32 %s1903_s23, 4  ;;  %s55_s22 = int_to_ptr.vmem [resolvable:$true] %s54_s22  ;;  %s2023_s24 = int_to_ptr.vmem [resolvable:$true] %s81_s24 }
   0xe   :  { %s2394_s3 = sld [smem:[#allocation31_spill]] }
  0x14   :  { %s1624_s26 = scalar_lea.hbm %s2394_s3, 1024 }
  0x15   :  { %p1625_p0 = scmp.ne.s32.totalorder %s2394_s3, %s1624_s26  ;;  %p1628_p1 = scmp.lt.u32.totalorder %s1624_s26, %s2394_s3 }
  0x17   :  { %p1630_p2 = pnand %p1628_p1, %p1625_p0 }
  0x19   :  { %1633 = shalt.err (!%p1630_p2)
}
  0x1a   :  { %s1634_s30 = scalar_lea.vmem %s55_s22, 1024  ;;  %p1639_p4 = scmp.lt.s32.totalorder %s55_s22, %s55_s22 }
  0x1b   :  { %p1635_p3 = scmp.ne.s32.totalorder %s55_s22, %s1634_s30  ;;  %p1640_p5 = scmp.lt.s32.totalorder %s1634_s30, %s1634_s30 }
  0x1d   :  { %p1641_p6 = por %p1640_p5, %p1639_p4 }
  0x1f   :  { %p1642_p7 = pnand %p1641_p6, %p1635_p3 }
  0x21   :  { %1645 = shalt.err (!%p1642_p7)
}
  0x22   :  { %s2387_s0 = smov 64   ;;  %s1905_s21 = smov 4  }
  0x23   :  { %60 = dma.hbm_to_vmem [thread:$0]  %s2394_s3, 1024, %s55_s22, [#allocation5], %s2387_s0, %s2387_s0, %s1905_s21  }
  0x24   :  { %s1646_s26 = scalar_lea.hbm %s2370_s6, 16 }
  0x25   :  { %p1647_p8 = scmp.ne.s32.totalorder %s2370_s6, %s1646_s26  ;;  %p1650_p9 = scmp.lt.u32.totalorder %s1646_s26, %s2370_s6 }
  0x27   :  { %p1652_p10 = pnand %p1650_p9, %p1647_p8 }
  0x29   :  { %1655 = shalt.err (!%p1652_p10)
}
  0x2a   :  { %s1656_s30 = scalar_lea.vmem %s2023_s24, 16  ;;  %s1660_s22 = scalar_lea.vmem %s2023_s24, 32 }
  0x2b   :  { %p1657_p11 = scmp.ne.s32.totalorder %s2023_s24, %s1656_s30  ;;  %p1661_p12 = scmp.lt.s32.totalorder %s2023_s24, %s2023_s24 }
  0x2c   :  { %p1662_p13 = scmp.lt.s32.totalorder %s1660_s22, %s1656_s30 }
  0x2e   :  { %p1663_p0 = por %p1662_p13, %p1661_p12 }
  0x30   :  { %p1664_p1 = pnand %p1663_p0, %p1657_p11 }
  0x32   :  { %1667 = shalt.err (!%p1664_p1)
}
  0x33   :  { %84 = dma.hbm_to_vmem [thread:$0]  %s2370_s6, 16, %s2023_s24, [#allocation8]  }
  0x34   :  { %s1906_s23 = smov [#allocation10]   ;;  %s1907_s25 = smov [#allocation13]  }
  0x35   :  { %s103_s2 = sshll.u32 %s1906_s23, 4  ;;  %s125_s26 = sshll.u32 %s1907_s25, 4  ;;  %s104_s2 = int_to_ptr.vmem [resolvable:$true] %s103_s2  ;;  %s126_s26 = int_to_ptr.vmem [resolvable:$true] %s125_s26 }
  0x36   :  { %s1668_s4 = scalar_lea.hbm %s2372_s8, 16 }
  0x37   :  { %p1669_p2 = scmp.ne.s32.totalorder %s2372_s8, %s1668_s4  ;;  %p1672_p3 = scmp.lt.u32.totalorder %s1668_s4, %s2372_s8 }
  0x39   :  { %p1674_p4 = pnand %p1672_p3, %p1669_p2 }
  0x3b   :  { %1677 = shalt.err (!%p1674_p4)
}
  0x3c   :  { %s1678_s6 = scalar_lea.vmem %s104_s2, 16  ;;  %s1682_s24 = scalar_lea.vmem %s104_s2, 32 }
  0x3d   :  { %p1679_p5 = scmp.ne.s32.totalorder %s104_s2, %s1678_s6  ;;  %p1683_p6 = scmp.lt.s32.totalorder %s104_s2, %s104_s2 }
  0x3e   :  { %p1684_p7 = scmp.lt.s32.totalorder %s1682_s24, %s1678_s6 }
  0x40   :  { %p1685_p8 = por %p1684_p7, %p1683_p6 }
  0x42   :  { %p1686_p9 = pnand %p1685_p8, %p1679_p5 }
  0x44   :  { %1689 = shalt.err (!%p1686_p9)
}
  0x45   :  { %106 = dma.hbm_to_vmem [thread:$0]  %s2372_s8, 16, %s104_s2, [#allocation11]  }
  0x46   :  { %s1690_s27 = scalar_lea.hbm %s2374_s10, 16 }
  0x47   :  { %p1691_p10 = scmp.ne.s32.totalorder %s2374_s10, %s1690_s27  ;;  %p1694_p11 = scmp.lt.u32.totalorder %s1690_s27, %s2374_s10 }
  0x49   :  { %p1696_p12 = pnand %p1694_p11, %p1691_p10 }
  0x4b   :  { %1699 = shalt.err (!%p1696_p12)
}
  0x4c   :  { %s1700_s30 = scalar_lea.vmem %s126_s26, 16  ;;  %s1704_s22 = scalar_lea.vmem %s126_s26, 32 }
  0x4d   :  { %p1701_p13 = scmp.ne.s32.totalorder %s126_s26, %s1700_s30  ;;  %p1705_p0 = scmp.lt.s32.totalorder %s126_s26, %s126_s26 }
  0x4e   :  { %p1706_p1 = scmp.lt.s32.totalorder %s1704_s22, %s1700_s30 }
  0x50   :  { %p1707_p2 = por %p1706_p1, %p1705_p0 }
  0x52   :  { %p1708_p3 = pnand %p1707_p2, %p1701_p13 }
  0x54   :  { %1711 = shalt.err (!%p1708_p3)
}
  0x55   :  { %128 = dma.hbm_to_vmem [thread:$0]  %s2374_s10, 16, %s126_s26, [#allocation14]  }
  0x56   :  { %s1908_s6 = smov [#allocation16]   ;;  %s1909_s3 = smov [#allocation2]  }
  0x57   :  { %s147_s24 = sshll.u32 %s1908_s6, 4  ;;  %s40_s1 = sshll.u32 %s1909_s3, 4  ;;  %s148_s24 = int_to_ptr.vmem [resolvable:$true] %s147_s24  ;;  %s2082_s1 = int_to_ptr.vmem [resolvable:$true] %s40_s1 }
  0x58   :  { %s1712_s27 = scalar_lea.hbm %s2376_s12, 16 }
  0x59   :  { %p1713_p4 = scmp.ne.s32.totalorder %s2376_s12, %s1712_s27  ;;  %p1716_p5 = scmp.lt.u32.totalorder %s1712_s27, %s2376_s12 }
  0x5b   :  { %p1718_p6 = pnand %p1716_p5, %p1713_p4 }
  0x5d   :  { %1721 = shalt.err (!%p1718_p6)
}
  0x5e   :  { %s1722_s10 = scalar_lea.vmem %s148_s24, 16  ;;  %s1726_s26 = scalar_lea.vmem %s148_s24, 32 }
  0x5f   :  { %p1723_p7 = scmp.ne.s32.totalorder %s148_s24, %s1722_s10  ;;  %p1727_p8 = scmp.lt.s32.totalorder %s148_s24, %s148_s24 }
  0x60   :  { %p1728_p9 = scmp.lt.s32.totalorder %s1726_s26, %s1722_s10 }
  0x62   :  { %p1729_p10 = por %p1728_p9, %p1727_p8 }
  0x64   :  { %p1730_p11 = pnand %p1729_p10, %p1723_p7 }
  0x66   :  { %1733 = shalt.err (!%p1730_p11)
}
  0x67   :  { %150 = dma.hbm_to_vmem [thread:$0]  %s2376_s12, 16, %s148_s24, [#allocation17]  }
  0x68   :  { %s2395_s6 = sld [smem:[#allocation29_spill]] }
  0x6e   :  { %s1734_s3 = scalar_lea.hbm %s2395_s6, 1024 }
  0x6f   :  { %p1735_p12 = scmp.ne.s32.totalorder %s2395_s6, %s1734_s3  ;;  %p1738_p13 = scmp.lt.u32.totalorder %s1734_s3, %s2395_s6 }
  0x71   :  { %p1740_p0 = pnand %p1738_p13, %p1735_p12 }
  0x73   :  { %1743 = shalt.err (!%p1740_p0)
}
  0x74   :  { %s1744_s28 = scalar_lea.vmem %s2082_s1, 1024  ;;  %p1749_p2 = scmp.lt.s32.totalorder %s2082_s1, %s2082_s1 }
  0x75   :  { %p1745_p1 = scmp.ne.s32.totalorder %s2082_s1, %s1744_s28  ;;  %p1750_p3 = scmp.lt.s32.totalorder %s1744_s28, %s1744_s28 }
  0x77   :  { %p1751_p4 = por %p1750_p3, %p1749_p2 }
  0x79   :  { %p1752_p5 = pnand %p1751_p4, %p1745_p1 }
  0x7b   :  { %1755 = shalt.err (!%p1752_p5)
}
  0x7c   :  { %s2396_s12 = smov 64   ;;  %s1910_s29 = smov [#allocation6]  }
  0x7d   :  { %46 = dma.hbm_to_vmem [thread:$0]  %s2395_s6, 1024, %s2082_s1, [#allocation3], %s2396_s12, %s2396_s12, %s1905_s21  }
  0x7e   :  { %s68_s10 = sshll.u32 %s1910_s29, 4  ;;  %s1911_s26 = smov [#allocation9]   ;;  %s69_s10 = int_to_ptr.vmem [resolvable:$true] %s68_s10 }
  0x7f   :  { %s90_s30 = sshll.u32 %s1911_s26, 4  ;;  %s1756_s2 = scalar_lea.hbm %s2369_s5, 1024  ;;  %s2116_s30 = int_to_ptr.vmem [resolvable:$true] %s90_s30 }
  0x80   :  { %p1757_p6 = scmp.ne.s32.totalorder %s2369_s5, %s1756_s2  ;;  %p1760_p7 = scmp.lt.u32.totalorder %s1756_s2, %s2369_s5 }
  0x82   :  { %p1762_p8 = pnand %p1760_p7, %p1757_p6 }
  0x84   :  { %1765 = shalt.err (!%p1762_p8)
}
  0x85   :  { %s1766_s1 = scalar_lea.vmem %s69_s10, 1024  ;;  %p1771_p10 = scmp.lt.s32.totalorder %s69_s10, %s69_s10 }
  0x86   :  { %p1767_p9 = scmp.ne.s32.totalorder %s69_s10, %s1766_s1  ;;  %p1772_p11 = scmp.lt.s32.totalorder %s1766_s1, %s1766_s1 }
  0x88   :  { %p1773_p12 = por %p1772_p11, %p1771_p10 }
  0x8a   :  { %p1774_p13 = pnand %p1773_p12, %p1767_p9 }
  0x8c   :  { %1777 = shalt.err (!%p1774_p13)
}
  0x8d   :  { %74 = dma.hbm_to_vmem [thread:$0]  %s2369_s5, 1024, %s69_s10, [#allocation5], %s2396_s12, %s2396_s12, %s1905_s21  }
  0x8e   :  { %s1778_s4 = scalar_lea.hbm %s2371_s7, 1024 }
  0x8f   :  { %p1779_p0 = scmp.ne.s32.totalorder %s2371_s7, %s1778_s4  ;;  %p1782_p1 = scmp.lt.u32.totalorder %s1778_s4, %s2371_s7 }
  0x91   :  { %p1784_p2 = pnand %p1782_p1, %p1779_p0 }
  0x93   :  { %1787 = shalt.err (!%p1784_p2)
}
  0x94   :  { %s1788_s2 = scalar_lea.vmem %s2116_s30, 1024  ;;  %p1793_p4 = scmp.lt.s32.totalorder %s2116_s30, %s2116_s30 }
  0x95   :  { %p1789_p3 = scmp.ne.s32.totalorder %s2116_s30, %s1788_s2  ;;  %p1794_p5 = scmp.lt.s32.totalorder %s1788_s2, %s1788_s2 }
  0x97   :  { %p1795_p6 = por %p1794_p5, %p1793_p4 }
  0x99   :  { %p1796_p7 = pnand %p1795_p6, %p1789_p3 }
  0x9b   :  { %1799 = shalt.err (!%p1796_p7)
}
  0x9c   :  { %96 = dma.hbm_to_vmem [thread:$0]  %s2371_s7, 1024, %s2116_s30, [#allocation8], %s2396_s12, %s2396_s12, %s1905_s21  }
  0x9d   :  { %s1912_s3 = smov [#allocation12]   ;;  %s1913_s25 = smov [#allocation15]  }
  0x9e   :  { %s112_s23 = sshll.u32 %s1912_s3, 4  ;;  %s134_s27 = sshll.u32 %s1913_s25, 4  ;;  %s113_s23 = int_to_ptr.vmem [resolvable:$true] %s112_s23  ;;  %s2153_s27 = int_to_ptr.vmem [resolvable:$true] %s134_s27 }
  0x9f   :  { %s1800_s0 = scalar_lea.hbm %s2373_s9, 1024 }
  0xa0   :  { %p1801_p8 = scmp.ne.s32.totalorder %s2373_s9, %s1800_s0  ;;  %p1804_p9 = scmp.lt.u32.totalorder %s1800_s0, %s2373_s9 }
  0xa2   :  { %p1806_p10 = pnand %p1804_p9, %p1801_p8 }
  0xa4   :  { %1809 = shalt.err (!%p1806_p10)
}
  0xa5   :  { %s1810_s7 = scalar_lea.vmem %s113_s23, 1024  ;;  %p1815_p12 = scmp.lt.s32.totalorder %s113_s23, %s113_s23 }
  0xa6   :  { %p1811_p11 = scmp.ne.s32.totalorder %s113_s23, %s1810_s7  ;;  %p1816_p13 = scmp.lt.s32.totalorder %s1810_s7, %s1810_s7 }
  0xa8   :  { %p1817_p0 = por %p1816_p13, %p1815_p12 }
  0xaa   :  { %p1818_p1 = pnand %p1817_p0, %p1811_p11 }
  0xac   :  { %1821 = shalt.err (!%p1818_p1)
}
  0xad   :  { %118 = dma.hbm_to_vmem [thread:$0]  %s2373_s9, 1024, %s113_s23, [#allocation11], %s2396_s12, %s2396_s12, %s1905_s21  }
  0xae   :  { %s1822_s2 = scalar_lea.hbm %s2375_s11, 1024 }
  0xaf   :  { %p1823_p2 = scmp.ne.s32.totalorder %s2375_s11, %s1822_s2  ;;  %p1826_p3 = scmp.lt.u32.totalorder %s1822_s2, %s2375_s11 }
  0xb1   :  { %p1828_p4 = pnand %p1826_p3, %p1823_p2 }
  0xb3   :  { %1831 = shalt.err (!%p1828_p4)
}
  0xb4   :  { %s1832_s1 = scalar_lea.vmem %s2153_s27, 1024  ;;  %p1837_p6 = scmp.lt.s32.totalorder %s2153_s27, %s2153_s27 }
  0xb5   :  { %p1833_p5 = scmp.ne.s32.totalorder %s2153_s27, %s1832_s1  ;;  %p1838_p7 = scmp.lt.s32.totalorder %s1832_s1, %s1832_s1 }
  0xb7   :  { %p1839_p8 = por %p1838_p7, %p1837_p6 }
  0xb9   :  { %p1840_p9 = pnand %p1839_p8, %p1833_p5 }
  0xbb   :  { %1843 = shalt.err (!%p1840_p9)
}
  0xbc   :  { %140 = dma.hbm_to_vmem [thread:$0]  %s2375_s11, 1024, %s2153_s27, [#allocation14], %s2396_s12, %s2396_s12, %s1905_s21  }
  0xbd   :  { %s1914_s6 = smov [#allocation18]   ;;  %s1915_s28 = smov [#allocation19]  }
  0xbe   :  { %s159_s0 = sshll.u32 %s1914_s6, 4  ;;  %s168_s24 = sshll.u32 %s1915_s28, 4  ;;  %s160_s0 = int_to_ptr.vmem [resolvable:$true] %s159_s0  ;;  %s2190_s24 = int_to_ptr.vmem [resolvable:$true] %s168_s24 }
  0xbf   :  { %s1844_s7 = scalar_lea.hbm %s2378_s14, 16 }
  0xc0   :  { %p1845_p10 = scmp.ne.s32.totalorder %s2378_s14, %s1844_s7  ;;  %p1848_p11 = scmp.lt.u32.totalorder %s1844_s7, %s2378_s14 }
  0xc2   :  { %p1850_p12 = pnand %p1848_p11, %p1845_p10 }
  0xc4   :  { %1853 = shalt.err (!%p1850_p12)
}
  0xc5   :  { %s1854_s11 = scalar_lea.vmem %s160_s0, 16  ;;  %s1858_s27 = scalar_lea.vmem %s160_s0, 32 }
  0xc6   :  { %p1855_p13 = scmp.ne.s32.totalorder %s160_s0, %s1854_s11  ;;  %p1859_p0 = scmp.lt.s32.totalorder %s160_s0, %s160_s0 }
  0xc7   :  { %p1860_p1 = scmp.lt.s32.totalorder %s1858_s27, %s1854_s11 }
  0xc9   :  { %p1861_p2 = por %p1860_p1, %p1859_p0 }
  0xcb   :  { %p1862_p3 = pnand %p1861_p2, %p1855_p13 }
  0xcd   :  { %1865 = shalt.err (!%p1862_p3)
}
  0xce   :  { %162 = dma.hbm_to_vmem [thread:$0]  %s2378_s14, 16, %s160_s0, [#allocation17]  }
  0xcf   :  { %s1866_s25 = scalar_lea.hbm %s2379_s15, 1024 }
  0xd0   :  { %p1867_p4 = scmp.ne.s32.totalorder %s2379_s15, %s1866_s25  ;;  %p1870_p5 = scmp.lt.u32.totalorder %s1866_s25, %s2379_s15 }
  0xd2   :  { %p1872_p6 = pnand %p1870_p5, %p1867_p4 }
  0xd4   :  { %1875 = shalt.err (!%p1872_p6)
}
  0xd5   :  { %s1876_s28 = scalar_lea.vmem %s2190_s24, 1024  ;;  %p1881_p8 = scmp.lt.s32.totalorder %s2190_s24, %s2190_s24 }
  0xd6   :  { %p1877_p7 = scmp.ne.s32.totalorder %s2190_s24, %s1876_s28  ;;  %p1882_p9 = scmp.lt.s32.totalorder %s1876_s28, %s1876_s28 }
  0xd8   :  { %p1883_p10 = por %p1882_p9, %p1881_p8 }
  0xda   :  { %p1884_p11 = pnand %p1883_p10, %p1877_p7 }
  0xdc   :  { %1887 = shalt.err (!%p1884_p11)
}
  0xdd   :  { %174 = dma.hbm_to_vmem [thread:$0]  %s2379_s15, 1024, %s2190_s24, [#allocation20], %s2396_s12, %s2396_s12, %s1905_s21  }
  0xde   :  { %1888 = dma.done.wait [#allocation3], 1024  }
  0xdf   :  { %1889 = vsyncadd [#allocation3], 4294966272 }
  0xe0   :  { %1890 = dma.done.wait [#allocation5], 2048  }
  0xe1   :  { %1891 = vsyncadd [#allocation5], 4294965248 }
  0xe2   :  { %1892 = dma.done.wait [#allocation8], 1040  }
  0xe3   :  { %1893 = vsyncadd [#allocation8], 4294966256 }
  0xe4   :  { %1894 = dma.done.wait [#allocation11], 1040  }
  0xe5   :  { %1895 = vsyncadd [#allocation11], 4294966256 }
  0xe6   :  { %1896 = dma.done.wait [#allocation14], 1040  }
  0xe7   :  { %1897 = vsyncadd [#allocation14], 4294966256 }
  0xe8   :  { %1898 = dma.done.wait [#allocation17], 32  }
  0xe9   :  { %1899 = vsyncadd [#allocation17], 4294967264 }
  0xea   :  { %1900 = dma.done.wait [#allocation20], 1024  }
  0xeb   :  { %1901 = vsyncadd [#allocation20], 4294966272  ;;  %v1916_v0 = vmov 0.0   ;;  %vm1917_vm0 = vmmov 0   ;;  %v1539_v1 = vld [vmem:[#allocation2] sm:$0xff]   ;;  %v1540_v2 = vld [vmem:[#allocation2 + $0x8] sm:$0xff]  }
  0xec   :  { %1363 = vmatprep.subr.bf16.mxu0 %v1916_v0  ;;  %1379 = vmatprep.mubr.msk.bf16.mxu0 %vm1917_vm0, %v1916_v0  ;;  %v1541_v3 = vld [vmem:[#allocation2 + $0x10] sm:$0xff]   ;;  %v1548_v4 = vld [vmem:[#allocation4] sm:$0xff]   ;;  %v1542_v5 = vld [vmem:[#allocation2 + $0x18] sm:$0xff]   ;;  %s2397_s12 = sld [smem:[#allocation28_spill]]  ;;  %s2398_s29 = sld [smem:[#allocation30_spill]] }
  0xed   :  { %1383 = vmatprep.subr.bf16.mxu1 %v1916_v0  ;;  %1399 = vmatprep.mubr.msk.bf16.mxu1 %vm1917_vm0, %v1916_v0  ;;  %v1549_v6 = vld [vmem:[#allocation4 + $0x8] sm:$0xff]   ;;  %v1543_v7 = vld [vmem:[#allocation2 + $0x20] sm:$0xff]   ;;  %v1550_v8 = vld [vmem:[#allocation4 + $0x10] sm:$0xff]   ;;  %s2399_s26 = sld [smem:[#allocation32_spill]] }
  0xee   :  { %1364 = vmatpush3.bf16.msra.mxu0 %v1539_v1  ;;  %1384 = vmatpush3.bf16.msra.mxu1 %v1548_v4  ;;  %v1544_v9 = vld [vmem:[#allocation2 + $0x28] sm:$0xff]   ;;  %v1551_v10 = vld [vmem:[#allocation4 + $0x18] sm:$0xff]   ;;  %v1545_v11 = vld [vmem:[#allocation2 + $0x30] sm:$0xff]  }
  0xef   :  { %1365 = vmatprep.subr.bf16.mxu0 %v1916_v0  ;;  %1385 = vmatprep.subr.bf16.mxu1 %v1916_v0  ;;  %v1552_v12 = vld [vmem:[#allocation4 + $0x20] sm:$0xff]   ;;  %v1546_v13 = vld [vmem:[#allocation2 + $0x38] sm:$0xff]   ;;  %v1553_v14 = vld [vmem:[#allocation4 + $0x28] sm:$0xff]  }
  0xf0   :  { %v1554_v16 = vld [vmem:[#allocation4 + $0x30] sm:$0xff]   ;;  %v1555_v17 = vld [vmem:[#allocation4 + $0x38] sm:$0xff]   ;;  %v1556_v18 = vld [vmem:[#allocation6] sm:$0xff]  }
  0xf1   :  { %v1557_v19 = vld [vmem:[#allocation6 + $0x8] sm:$0xff]   ;;  %v1558_v20 = vld [vmem:[#allocation6 + $0x10] sm:$0xff]   ;;  %v1559_v21 = vld [vmem:[#allocation6 + $0x18] sm:$0xff]  }
  0xf2   :  { %1366 = vmatpush3.bf16.msra.mxu0 %v1540_v2  ;;  %1386 = vmatpush3.bf16.msra.mxu1 %v1549_v6  ;;  %v1547_v15 = vld [vmem:[%s2397_s12] sm:$0xff]   ;;  %v1561_v23 = vld [vmem:[#allocation6 + $0x28] sm:$0xff]   ;;  %v1562_v34 = vld [vmem:[#allocation6 + $0x30] sm:$0xff]  }
  0xf3   :  { %1367 = vmatprep.subr.bf16.mxu0 %v1916_v0  ;;  %1387 = vmatprep.subr.bf16.mxu1 %v1916_v0  ;;  %v1560_v22 = vld [vmem:[#allocation6 + $0x20] sm:$0xff]   ;;  %v1563_v35 = vld [vmem:[#allocation6 + $0x38] sm:$0xff]   ;;  %v1565_v37 = vld [vmem:[#allocation9 + $0x8] sm:$0xff]  }
  0xf4   :  { %v1216_v24 = vld [vmem:[%s2398_s29] ss:$0 sm:$0xff]  ;;  %v1564_v36 = vld [vmem:[#allocation9] sm:$0xff]   ;;  %v1566_v38 = vld [vmem:[#allocation9 + $0x10] sm:$0xff]  }
  0xf5   :  { %v1567_v39 = vld [vmem:[#allocation9 + $0x18] sm:$0xff]   ;;  %v1568_v40 = vld [vmem:[#allocation9 + $0x20] sm:$0xff]   ;;  %v1569_v41 = vld [vmem:[#allocation9 + $0x28] sm:$0xff]  }
  0xf6   :  { %1368 = vmatpush3.bf16.msra.mxu0 %v1541_v3  ;;  %1388 = vmatpush3.bf16.msra.mxu1 %v1550_v8  ;;  %v1226_v42 = vld [vmem:[%s2399_s26] ss:$0 sm:$0xff]  ;;  %v1570_v52 = vld [vmem:[#allocation9 + $0x30] sm:$0xff]   ;;  %v1572_v54 = vld [vmem:[#allocation12] sm:$0xff]  }
  0xf7   :  { %1369 = vmatprep.subr.bf16.mxu0 %v1916_v0  ;;  %1389 = vmatprep.subr.bf16.mxu1 %v1916_v0  ;;  %v1571_v53 = vld [vmem:[#allocation9 + $0x38] sm:$0xff]   ;;  %v1573_v55 = vld [vmem:[#allocation12 + $0x8] sm:$0xff]   ;;  %v1576_v58 = vld [vmem:[#allocation12 + $0x20] sm:$0xff]  }
  0xf8   :  { %v1574_v56 = vld [vmem:[#allocation12 + $0x10] sm:$0xff]   ;;  %v1575_v57 = vld [vmem:[#allocation12 + $0x18] sm:$0xff]   ;;  %v1577_v59 = vld [vmem:[#allocation12 + $0x28] sm:$0xff]  }
  0xf9   :  { %v1235_v60 = vld [vmem:[#allocation7] ss:$0 sm:$0xff]  ;;  %v1582_v8 = vld [vmem:[#allocation15 + $0x8] sm:$0xff]  }
  0xfa   :  { %1370 = vmatpush3.bf16.msra.mxu0 %v1542_v5  ;;  %1390 = vmatpush3.bf16.msra.mxu1 %v1551_v10  ;;  %v1578_v5 = vld [vmem:[#allocation12 + $0x30] sm:$0xff]   ;;  %v1579_v6 = vld [vmem:[#allocation12 + $0x38] sm:$0xff]  }
  0xfb   :  { %1371 = vmatprep.subr.bf16.mxu0 %v1916_v0  ;;  %1391 = vmatprep.subr.bf16.mxu1 %v1916_v0  ;;  %v1586_v10 = vld [vmem:[#allocation15 + $0x18] sm:$0xff]  }
  0xfe   :  { %1372 = vmatpush3.bf16.msra.mxu0 %v1543_v7  ;;  %1392 = vmatpush3.bf16.msra.mxu1 %v1552_v12  ;;  %v1580_v7 = vld [vmem:[#allocation15] sm:$0xff]   ;;  %v1590_v12 = vld [vmem:[#allocation15 + $0x28] sm:$0xff]  }
  0xff   :  { %1373 = vmatprep.subr.bf16.mxu0 %v1916_v0  ;;  %1393 = vmatprep.subr.bf16.mxu1 %v1916_v0 }
 0x102   :  { %1374 = vmatpush3.bf16.msra.mxu0 %v1544_v9  ;;  %1394 = vmatpush3.bf16.msra.mxu1 %v1553_v14  ;;  %v1584_v9 = vld [vmem:[#allocation15 + $0x10] sm:$0xff]  }
 0x103   :  { %1375 = vmatprep.subr.bf16.mxu0 %v1916_v0  ;;  %1395 = vmatprep.subr.bf16.mxu1 %v1916_v0 }
 0x106   :  { %1376 = vmatpush3.bf16.msra.mxu0 %v1545_v11  ;;  %1396 = vmatpush3.bf16.msra.mxu1 %v1554_v16  ;;  %v1588_v11 = vld [vmem:[#allocation15 + $0x20] sm:$0xff]  }
 0x107   :  { %1377 = vmatprep.subr.bf16.mxu0 %v1916_v0  ;;  %1397 = vmatprep.subr.bf16.mxu1 %v1916_v0 }
 0x10a   :  { %1378 = vmatpush3.bf16.msra.mxu0 %v1546_v13  ;;  %1398 = vmatpush3.bf16.msra.mxu1 %v1555_v17  ;;  %v1244_v13 = vld [vmem:[#allocation10] ss:$0 sm:$0xff] }
 0x10b   :  { %1403 = vmatprep.subr.bf16.mxu0 %v1916_v0  ;;  %1423 = vmatprep.subr.bf16.mxu1 %v1916_v0 }
 0x10d   :  { %1380 = vmatmul.mubr.bf16.vlgmr.msra.gmra.mrb[0].mxu0 %v1547_v15 }
 0x10e   :  { %1419 = vmatprep.mubr.msk.bf16.mxu0 %vm1917_vm0, %v1916_v0  ;;  %1404 = vmatpush3.bf16.msra.mxu0 %v1556_v18 }
 0x10f   :  { %1405 = vmatprep.subr.bf16.mxu0 %v1916_v0 }
 0x112   :  { %1406 = vmatpush3.bf16.msra.mxu0 %v1557_v19 }
 0x113   :  { %1407 = vmatprep.subr.bf16.mxu0 %v1916_v0 }
 0x116   :  { %1408 = vmatpush3.bf16.msra.mxu0 %v1558_v20 }
 0x117   :  { %1409 = vmatprep.subr.bf16.mxu0 %v1916_v0 }
 0x11a   :  { %1410 = vmatpush3.bf16.msra.mxu0 %v1559_v21 }
 0x11b   :  { %1411 = vmatprep.subr.bf16.mxu0 %v1916_v0 }
 0x11e   :  { %1412 = vmatpush3.bf16.msra.mxu0 %v1560_v22  ;;  %v1581_v22 = vld [vmem:[%s2377_s13] sm:$0xff]  }
 0x11f   :  { %1413 = vmatprep.subr.bf16.mxu0 %v1916_v0 }
 0x122   :  { %1414 = vmatpush3.bf16.msra.mxu0 %v1561_v23 }
 0x123   :  { %1415 = vmatprep.subr.bf16.mxu0 %v1916_v0 }
 0x126   :  { %1416 = vmatpush3.bf16.msra.mxu0 %v1562_v34 }
 0x127   :  { %1417 = vmatprep.subr.bf16.mxu0 %v1916_v0 }
 0x12a   :  { %1418 = vmatpush3.bf16.msra.mxu0 %v1563_v35 }
 0x12b   :  { %1443 = vmatprep.subr.bf16.mxu0 %v1916_v0 }
 0x1e0   :  { %v327_v25 = vpop.f32.mrb[0].mxu0 }
 0x1e1   :  { %v328_v26 = vadd.f32 %v1216_v24, %v327_v25  ;;  %v1381_v27 = vpop.f32.mrb[1].mxu0  ;;  %v1585_v25 = vld [vmem:[%s2377_s13 + $0x10] sm:$0xff]  }
 0x1e2   :  { %v330_v28 = vpop.f32.mrb[2].mxu0  ;;  %v1589_v27 = vld [vmem:[%s2377_s13 + $0x20] sm:$0xff]  }
 0x1e3   :  { %v331_v29 = vadd.f32 %v1216_v24, %v330_v28  ;;  %v1382_v30 = vpop.f32.mrb[3].mxu0  ;;  %v334_v31 = vmax.f32 %v328_v26, 0.0  ;;  %v1583_v24 = vld [vmem:[%s2377_s13 + $0x8] sm:$0xff]   ;;  %v1587_v26 = vld [vmem:[%s2377_s13 + $0x18] sm:$0xff]  }
 0x1e4   :  { %v1591_v28 = vld [vmem:[%s2377_s13 + $0x28] sm:$0xff]   ;;  %v1593_v30 = vld [vmem:[%s2377_s13 + $0x30] sm:$0xff]  }
 0x1e5   :  { %v335_v32 = vmax.f32 %v331_v29, 0.0  ;;  %v1592_v29 = vld [vmem:[#allocation15 + $0x30] sm:$0xff]  }
 0x1e7   :  { %v336_v33 = vpack.c.bf16 %v335_v32, %v334_v31  ;;  %v1594_v31 = vld [vmem:[#allocation15 + $0x38] sm:$0xff]  }
 0x1e8   :  { %v1595_v32 = vld [vmem:[%s2377_s13 + $0x38] sm:$0xff]  }
 0x1e9   :  { %1400 = vmatmul.mubr.bf16.vlgmr.msra.gmra.mrb[0].mxu1 %v336_v33  ;;  %v1253_v33 = vld [vmem:[#allocation13] ss:$0 sm:$0xff] }
 0x1ea   :  { %1439 = vmatprep.mubr.msk.bf16.mxu1 %vm1917_vm0, %v1916_v0  ;;  %1424 = vmatpush3.bf16.msra.mxu1 %v1564_v36 }
 0x1eb   :  { %1425 = vmatprep.subr.bf16.mxu1 %v1916_v0 }
 0x1ee   :  { %1426 = vmatpush3.bf16.msra.mxu1 %v1565_v37 }
 0x1ef   :  { %1427 = vmatprep.subr.bf16.mxu1 %v1916_v0 }
 0x1f2   :  { %1428 = vmatpush3.bf16.msra.mxu1 %v1566_v38 }
 0x1f3   :  { %1429 = vmatprep.subr.bf16.mxu1 %v1916_v0 }
 0x1f6   :  { %1430 = vmatpush3.bf16.msra.mxu1 %v1567_v39 }
 0x1f7   :  { %1431 = vmatprep.subr.bf16.mxu1 %v1916_v0 }
 0x1fa   :  { %1432 = vmatpush3.bf16.msra.mxu1 %v1568_v40 }
 0x1fb   :  { %1433 = vmatprep.subr.bf16.mxu1 %v1916_v0 }
 0x1fe   :  { %1434 = vmatpush3.bf16.msra.mxu1 %v1569_v41 }
 0x1ff   :  { %1435 = vmatprep.subr.bf16.mxu1 %v1916_v0 }
 0x202   :  { %1436 = vmatpush3.bf16.msra.mxu1 %v1570_v52  ;;  %v1271_v52 = vld [vmem:[#allocation18] ss:$0 sm:$0xff] }
 0x203   :  { %1437 = vmatprep.subr.bf16.mxu1 %v1916_v0 }
 0x206   :  { %1438 = vmatpush3.bf16.msra.mxu1 %v1571_v53 }
 0x207   :  { %1463 = vmatprep.subr.bf16.mxu1 %v1916_v0 }
 0x2bc   :  { %v442_v43 = vpop.f32.mrb[0].mxu1 }
 0x2bd   :  { %v443_v44 = vadd.f32 %v1226_v42, %v442_v43  ;;  %v1401_v45 = vpop.f32.mrb[1].mxu1 }
 0x2be   :  { %v445_v46 = vpop.f32.mrb[2].mxu1  ;;  %v1598_v45 = vld [vmem:[#allocation19 + $0x10] sm:$0xff]  }
 0x2bf   :  { %v446_v47 = vadd.f32 %v1226_v42, %v445_v46  ;;  %v1402_v48 = vpop.f32.mrb[3].mxu1  ;;  %v449_v49 = vmax.f32 %v443_v44, 0.0  ;;  %v1596_v42 = vld [vmem:[#allocation19] sm:$0xff]   ;;  %v1597_v44 = vld [vmem:[#allocation19 + $0x8] sm:$0xff]   ;;  %v1599_v46 = vld [vmem:[#allocation19 + $0x18] sm:$0xff]  }
 0x2c0   :  { %v1601_v48 = vld [vmem:[#allocation19 + $0x28] sm:$0xff]  }
 0x2c1   :  { %v450_v50 = vmax.f32 %v446_v47, 0.0  ;;  %v1600_v47 = vld [vmem:[#allocation19 + $0x20] sm:$0xff]  }
 0x2c3   :  { %v451_v51 = vpack.c.bf16 %v450_v50, %v449_v49  ;;  %v1602_v49 = vld [vmem:[#allocation19 + $0x30] sm:$0xff]   ;;  %v1603_v50 = vld [vmem:[#allocation19 + $0x38] sm:$0xff]  }
 0x2c5   :  { %1420 = vmatmul.mubr.bf16.vlgmr.msra.gmra.mrb[4].mxu0 %v451_v51  ;;  %v1262_v51 = vld [vmem:[#allocation16] ss:$0 sm:$0xff] }
 0x2c6   :  { %1459 = vmatprep.mubr.msk.bf16.mxu0 %vm1917_vm0, %v1916_v0  ;;  %1444 = vmatpush3.bf16.msra.mxu0 %v1572_v54 }
 0x2c7   :  { %1445 = vmatprep.subr.bf16.mxu0 %v1916_v0 }
 0x2ca   :  { %1446 = vmatpush3.bf16.msra.mxu0 %v1573_v55 }
 0x2cb   :  { %1447 = vmatprep.subr.bf16.mxu0 %v1916_v0 }
 0x2ce   :  { %1448 = vmatpush3.bf16.msra.mxu0 %v1574_v56 }
 0x2cf   :  { %1449 = vmatprep.subr.bf16.mxu0 %v1916_v0 }
 0x2d2   :  { %1450 = vmatpush3.bf16.msra.mxu0 %v1575_v57 }
 0x2d3   :  { %1451 = vmatprep.subr.bf16.mxu0 %v1916_v0 }
 0x2d6   :  { %1452 = vmatpush3.bf16.msra.mxu0 %v1576_v58 }
 0x2d7   :  { %1453 = vmatprep.subr.bf16.mxu0 %v1916_v0 }
 0x2da   :  { %1454 = vmatpush3.bf16.msra.mxu0 %v1577_v59 }
 0x2db   :  { %1455 = vmatprep.subr.bf16.mxu0 %v1916_v0 }
 0x2de   :  { %1456 = vmatpush3.bf16.msra.mxu0 %v1578_v5 }
 0x2df   :  { %1457 = vmatprep.subr.bf16.mxu0 %v1916_v0 }
 0x2e2   :  { %1458 = vmatpush3.bf16.msra.mxu0 %v1579_v6 }
 0x2e3   :  { %1483 = vmatprep.subr.bf16.mxu0 %v1916_v0 }
 0x398   :  { %v557_v61 = vpop.f32.mrb[4].mxu0 }
 0x399   :  { %v558_v62 = vadd.f32 %v1235_v60, %v557_v61  ;;  %v1421_v63 = vpop.f32.mrb[5].mxu0 }
 0x39a   :  { %v560_v1 = vpop.f32.mrb[6].mxu0 }
 0x39b   :  { %564 = vst [vmem:[%s2381_s17] sm:$0xff] %v558_v62  ;;  %v561_v2 = vadd.f32 %v1235_v60, %v560_v1  ;;  %v1422_v3 = vpop.f32.mrb[7].mxu0 }
 0x39d   :  { %565 = vst [vmem:[%s2381_s17 + $0x8] sm:$0xff] %v561_v2  ;;  %v566_v4 = vpack.c.bf16 %v561_v2, %v558_v62 }
 0x39f   :  { %1440 = vmatmul.mubr.bf16.vlgmr.msra.gmra.mrb[4].mxu1 %v566_v4 }
 0x3a0   :  { %1479 = vmatprep.mubr.msk.bf16.mxu1 %vm1917_vm0, %v1916_v0  ;;  %1464 = vmatpush3.bf16.msra.mxu1 %v1580_v7 }
 0x3a1   :  { %1465 = vmatprep.subr.bf16.mxu1 %v1916_v0 }
 0x3a4   :  { %1466 = vmatpush3.bf16.msra.mxu1 %v1582_v8 }
 0x3a5   :  { %1467 = vmatprep.subr.bf16.mxu1 %v1916_v0 }
 0x3a8   :  { %1468 = vmatpush3.bf16.msra.mxu1 %v1584_v9 }
 0x3a9   :  { %1469 = vmatprep.subr.bf16.mxu1 %v1916_v0 }
 0x3ac   :  { %1470 = vmatpush3.bf16.msra.mxu1 %v1586_v10 }
 0x3ad   :  { %1471 = vmatprep.subr.bf16.mxu1 %v1916_v0 }
 0x3b0   :  { %1472 = vmatpush3.bf16.msra.mxu1 %v1588_v11 }
 0x3b1   :  { %1473 = vmatprep.subr.bf16.mxu1 %v1916_v0 }
 0x3b4   :  { %1474 = vmatpush3.bf16.msra.mxu1 %v1590_v12 }
 0x3b5   :  { %1475 = vmatprep.subr.bf16.mxu1 %v1916_v0 }
 0x3b8   :  { %1476 = vmatpush3.bf16.msra.mxu1 %v1592_v29 }
 0x3b9   :  { %1477 = vmatprep.subr.bf16.mxu1 %v1916_v0 }
 0x3bc   :  { %1478 = vmatpush3.bf16.msra.mxu1 %v1594_v31 }
 0x3bd   :  { %1503 = vmatprep.subr.bf16.mxu1 %v1916_v0 }
 0x472   :  { %v672_v14 = vpop.f32.mrb[4].mxu1 }
 0x473   :  { %v673_v15 = vadd.f32 %v1244_v13, %v672_v14  ;;  %v1441_v16 = vpop.f32.mrb[5].mxu1 }
 0x474   :  { %v675_v17 = vpop.f32.mrb[6].mxu1 }
 0x475   :  { %v676_v18 = vadd.f32 %v1244_v13, %v675_v17  ;;  %v1442_v19 = vpop.f32.mrb[7].mxu1  ;;  %v679_v20 = vmax.f32 %v673_v15, 0.0 }
 0x477   :  { %v680_v21 = vmax.f32 %v676_v18, 0.0 }
 0x479   :  { %v681_v23 = vpack.c.bf16 %v680_v21, %v679_v20 }
 0x47b   :  { %1460 = vmatmul.mubr.bf16.vlgmr.msra.gmra.mrb[8].mxu0 %v681_v23  ;;  %v1280_v23 = vld [vmem:[%s2380_s16] ss:$0 sm:$0xff] }
 0x47c   :  { %1484 = vmatpush3.bf16.msra.mxu0 %v1581_v22  ;;  %1499 = vmatprep.mubr.msk.bf16.mxu0 %vm1917_vm0, %v1916_v0 }
 0x47d   :  { %1485 = vmatprep.subr.bf16.mxu0 %v1916_v0 }
 0x480   :  { %1486 = vmatpush3.bf16.msra.mxu0 %v1583_v24 }
 0x481   :  { %1487 = vmatprep.subr.bf16.mxu0 %v1916_v0 }
 0x484   :  { %1488 = vmatpush3.bf16.msra.mxu0 %v1585_v25 }
 0x485   :  { %1489 = vmatprep.subr.bf16.mxu0 %v1916_v0 }
 0x488   :  { %1490 = vmatpush3.bf16.msra.mxu0 %v1587_v26 }
 0x489   :  { %1491 = vmatprep.subr.bf16.mxu0 %v1916_v0 }
 0x48c   :  { %1492 = vmatpush3.bf16.msra.mxu0 %v1589_v27 }
 0x48d   :  { %1493 = vmatprep.subr.bf16.mxu0 %v1916_v0 }
 0x490   :  { %1494 = vmatpush3.bf16.msra.mxu0 %v1591_v28 }
 0x491   :  { %1495 = vmatprep.subr.bf16.mxu0 %v1916_v0 }
 0x494   :  { %1496 = vmatpush3.bf16.msra.mxu0 %v1593_v30 }
 0x495   :  { %1497 = vmatprep.subr.bf16.mxu0 %v1916_v0 }
 0x498   :  { %1498 = vmatpush3.bf16.msra.mxu0 %v1595_v32 }
 0x54e   :  { %v787_v34 = vpop.f32.mrb[8].mxu0 }
 0x54f   :  { %v788_v35 = vadd.f32 %v1253_v33, %v787_v34  ;;  %v1461_v36 = vpop.f32.mrb[9].mxu0 }
 0x550   :  { %v790_v37 = vpop.f32.mrb[10].mxu0 }
 0x551   :  { %v791_v38 = vadd.f32 %v1253_v33, %v790_v37  ;;  %v1462_v39 = vpop.f32.mrb[11].mxu0  ;;  %v794_v40 = vmax.f32 %v788_v35, 0.0 }
 0x553   :  { %v795_v41 = vmax.f32 %v791_v38, 0.0 }
 0x555   :  { %v796_v43 = vpack.c.bf16 %v795_v41, %v794_v40 }
 0x557   :  { %1480 = vmatmul.mubr.bf16.vlgmr.msra.gmra.mrb[8].mxu1 %v796_v43  ;;  %1500 = vmatmul.mubr.bf16.vlgmr.msra.gmra.mrb[12].mxu0 %v796_v43 }
 0x558   :  { %1504 = vmatpush3.bf16.msra.mxu1 %v1596_v42  ;;  %1519 = vmatprep.mubr.msk.bf16.mxu1 %vm1917_vm0, %v1916_v0 }
 0x559   :  { %1505 = vmatprep.subr.bf16.mxu1 %v1916_v0 }
 0x55c   :  { %1506 = vmatpush3.bf16.msra.mxu1 %v1597_v44 }
 0x55d   :  { %1507 = vmatprep.subr.bf16.mxu1 %v1916_v0 }
 0x560   :  { %1508 = vmatpush3.bf16.msra.mxu1 %v1598_v45 }
 0x561   :  { %1509 = vmatprep.subr.bf16.mxu1 %v1916_v0 }
 0x564   :  { %1510 = vmatpush3.bf16.msra.mxu1 %v1599_v46 }
 0x565   :  { %1511 = vmatprep.subr.bf16.mxu1 %v1916_v0 }
 0x568   :  { %1512 = vmatpush3.bf16.msra.mxu1 %v1600_v47 }
 0x569   :  { %1513 = vmatprep.subr.bf16.mxu1 %v1916_v0 }
 0x56c   :  { %1514 = vmatpush3.bf16.msra.mxu1 %v1601_v48 }
 0x56d   :  { %1515 = vmatprep.subr.bf16.mxu1 %v1916_v0 }
 0x570   :  { %1516 = vmatpush3.bf16.msra.mxu1 %v1602_v49 }
 0x571   :  { %1517 = vmatprep.subr.bf16.mxu1 %v1916_v0 }
 0x574   :  { %1518 = vmatpush3.bf16.msra.mxu1 %v1603_v50 }
 0x577   :  { %1520 = vmatmul.mubr.bf16.vlgmr.msra.gmra.mrb[12].mxu1 %v796_v43 }
 0x62a   :  { %v902_v53 = vpop.f32.mrb[8].mxu1  ;;  %v1024_v54 = vpop.f32.mrb[12].mxu0 }
 0x62b   :  { %v903_v55 = vadd.f32 %v1262_v51, %v902_v53  ;;  %v1025_v56 = vadd.f32 %v1271_v52, %v1024_v54  ;;  %v1481_v57 = vpop.f32.mrb[9].mxu1  ;;  %v1501_v58 = vpop.f32.mrb[13].mxu0 }
 0x62c   :  { %v905_v59 = vpop.f32.mrb[10].mxu1  ;;  %v1027_v60 = vpop.f32.mrb[14].mxu0 }
 0x62d   :  { %v909_v61 = vmul.f32 1.442695, %v903_v55  ;;  %v1033_v62 = vand.u32 2147483647, %v1025_v56  ;;  %v906_v63 = vadd.f32 %v1262_v51, %v905_v59  ;;  %v1482_v1 = vpop.f32.mrb[11].mxu1  ;;  %v1028_v2 = vadd.f32 %v1271_v52, %v1027_v60  ;;  %v1502_v3 = vpop.f32.mrb[15].mxu0 }
 0x62e   :  { %v1031_v32 = vmax.f32 %v1025_v56, 0.0 }
 0x62f   :  { %1604 = vpow2.f32 %v909_v61  ;;  %v1035_v0 = vsub.f32 0.0, %v1033_v62  ;;  %v911_v4 = vmul.f32 1.442695, %v906_v63  ;;  %v1034_v5 = vand.u32 2147483647, %v1028_v2 }
 0x630   :  { %v1032_v42 = vmax.f32 %v1028_v2, 0.0 }
 0x631   :  { %v1037_v6 = vmul.f32 1.442695, %v1035_v0  ;;  %1606 = vpow2.f32 %v911_v4  ;;  %v1036_v7 = vsub.f32 0.0, %v1034_v5 }
 0x633   :  { %1608 = vpow2.f32 %v1037_v6  ;;  %v1039_v8 = vmul.f32 1.442695, %v1036_v7 }
 0x635   :  { %1610 = vpow2.f32 %v1039_v8 }
 0x639   :  { %v1605_v9 = vpop.eup %1604 }
 0x63a   :  { %v913_v10 = vmax.f32 %v1605_v9, 1e-05 }
 0x63b   :  { %v1607_v11 = vpop.eup %1606 }
 0x63c   :  { %v915_v12 = vmin.f32 %v913_v10, 1000000.0  ;;  %v914_v13 = vmax.f32 %v1607_v11, 1e-05 }
 0x63d   :  { %v1609_v14 = vpop.eup %1608 }
 0x63e   :  { %917 = vst [vmem:[%s2382_s18] sm:$0xff] %v915_v12  ;;  %v1041_v15 = vadd.f32 1.0, %v1609_v14  ;;  %v916_v16 = vmin.f32 %v914_v13, 1000000.0  ;;  %v1044_v19 = vmul.f32 -0.5, %v1609_v14  ;;  %v1047_v22 = vand.u32 2147483647, %v1609_v14 }
 0x63f   :  { %v1611_v17 = vpop.eup %1610 }
 0x640   :  { %1612 = vlog2.f32 %v1041_v15  ;;  %918 = vst [vmem:[%s2382_s18 + $0x8] sm:$0xff] %v916_v16  ;;  %v1050_v18 = vadd.f32 1.0, %v1611_v17  ;;  %v1053_v20 = vmul.f32 -0.5, %v1611_v17  ;;  %v1045_v21 = vadd.f32 1.0, %v1044_v19 }
 0x641   :  { %v1056_v29 = vand.u32 2147483647, %v1611_v17  ;;  %vm1048_vm1 = vcmp.lt.f32.partialorder %v1047_v22, 0.0004427343 }
 0x642   :  { %1614 = vlog2.f32 %v1050_v18  ;;  %v1054_v25 = vadd.f32 1.0, %v1053_v20  ;;  %v1046_v28 = vmul.f32 %v1609_v14, %v1045_v21 }
 0x643   :  { %vm1057_vm2 = vcmp.lt.f32.partialorder %v1056_v29, 0.0004427343 }
 0x644   :  { %v1055_v41 = vmul.f32 %v1611_v17, %v1054_v25 }
 0x64a   :  { %v1613_v24 = vpop.eup %1612  ;;  %v1172_v26 = vpop.f32.mrb[12].mxu1 }
 0x64b   :  { %v1043_v27 = vmul.f32 0.6931472, %v1613_v24  ;;  %v1173_v30 = vadd.f32 %v1280_v23, %v1172_v26  ;;  %v1521_v31 = vpop.f32.mrb[13].mxu1 }
 0x64c   :  { %v1175_v33 = vpop.f32.mrb[14].mxu1  ;;  %v1615_v34 = vpop.eup %1614 }
 0x64d   :  { %v1049_v35 = vsel %vm1048_vm1, %v1046_v28, %v1043_v27  ;;  %v1289_v36 = vmul.f32 -1.442695, %v1173_v30  ;;  %v1176_v37 = vadd.f32 %v1280_v23, %v1175_v33  ;;  %v1522_v38 = vpop.f32.mrb[15].mxu1  ;;  %v1052_v40 = vmul.f32 0.6931472, %v1615_v34 }
 0x64e   :  { %v1059_v39 = vadd.f32 %v1049_v35, %v1031_v32 }
 0x64f   :  { %1616 = vpow2.f32 %v1289_v36  ;;  %v1290_v43 = vmul.f32 -1.442695, %v1176_v37  ;;  %v1058_v45 = vsel %vm1057_vm2, %v1055_v41, %v1052_v40 }
 0x650   :  { %v1061_v44 = vmax.f32 %v1059_v39, 0.0001  ;;  %v1060_v46 = vadd.f32 %v1058_v45, %v1032_v42 }
 0x651   :  { %1618 = vpow2.f32 %v1290_v43 }
 0x652   :  { %v1063_v47 = vmin.f32 %v1061_v44, 10000.0  ;;  %v1062_v48 = vmax.f32 %v1060_v46, 0.0001 }
 0x654   :  { %1065 = vst [vmem:[%s2383_s19] sm:$0xff] %v1063_v47  ;;  %v1064_v49 = vmin.f32 %v1062_v48, 10000.0 }
 0x656   :  { %1066 = vst [vmem:[%s2383_s19 + $0x8] sm:$0xff] %v1064_v49 }
 0x659   :  { %v1617_v50 = vpop.eup %1616 }
 0x65a   :  { %v1185_v51 = vadd.f32 1.0, %v1617_v50 }
 0x65b   :  { %v1619_v52 = vpop.eup %1618 }
 0x65c   :  { %1620 = vrcp.f32 %v1185_v51  ;;  %v1186_v53 = vadd.f32 1.0, %v1619_v52 }
 0x65e   :  { %1622 = vrcp.f32 %v1186_v53 }
 0x666   :  { %v1621_v54 = vpop.eup %1620 }
 0x667   :  { %1191 = vst [vmem:[%s2384_s20] sm:$0xff] %v1621_v54 }
 0x668   :  { %v1623_v55 = vpop.eup %1622 }
 0x669   :  { %1192 = vst [vmem:[%s2384_s20 + $0x8] sm:$0xff] %v1623_v55 }
 0x66a   :  { %1209 = vsyncpa [#allocation3], 1 }
 0x66b   :  { %1210 = vsyncpa [#allocation5], 1 }
 0x66c   :  { %1211 = vsyncpa [#allocation8], 1 }
 0x66d   :  { %1212 = vsyncpa [#allocation11], 1 }
 0x66e   :  { %1213 = vsyncpa [#allocation14], 1 }
 0x66f   :  { %1214 = vsyncpa [#allocation17], 1 }
 0x670   :  { %1215 = vsyncpa [#allocation20], 1 }

</bundles_post_ra>
